<compile_context>
chip_gen: v6e
topology: v6e:2x2x1
jax: 0.10.0
libtpu: 0.0.40
codegen_flags: <defaults>
</compile_context>

<pallas_src>
import functools

import jax
import jax.numpy as jnp
from jax import lax
from jax.experimental import pallas as pl
from jax.experimental.pallas import tpu as pltpu

HIDDEN = 50
HIDDEN_PAD = 128          # hidden dim zero-padded to a lane multiple (exact)
MAX_TB = 32768            # absolute cap on batch-tile rows


def reward_mlp_kernel(x_ref, w1_ref, b1_ref, w2_ref, b2_ref, w3_ref, b3_ref, o_ref):
    x = x_ref[...]                                                     # (TB, dim)
    h1 = jnp.dot(x, w1_ref[...], preferred_element_type=jnp.float32) + b1_ref[...]
    h1 = jnp.maximum(h1, 0.0)                                          # (TB, 128)
    h2 = jnp.dot(h1, w2_ref[...], preferred_element_type=jnp.float32) + b2_ref[...]
    h2 = jnp.maximum(h2, 0.0)                                          # (TB, 128)
    # Final Linear(50,1) (normalization pre-folded into w3/b3), emitted as a
    # lane-dense (1, TB) row on the MXU: contract lane dim of (1,128)x(TB,128).
    out_row = lax.dot_general(w3_ref[...], h2, (((1,), (1,)), ((), ())),
                              preferred_element_type=jnp.float32)      # (1, TB)
    o_ref[...] = out_row + b3_ref[...]


def _pad_to(a, shape):
    pads = [(0, s - d) for s, d in zip(shape, a.shape)]
    return jnp.pad(a, pads)


def _resident_spec(shape):
    """Weights/biases: constant index_map -> stay resident in VMEM.  Single-
    buffer them (Buffered(1)); fall back if this jax build lacks pipeline_mode."""
    idx = lambda i: (0, 0)
    try:
        return pl.BlockSpec(shape, idx, pipeline_mode=pl.Buffered(1))
    except TypeError:  # older BlockSpec without pipeline_mode kwarg
        return pl.BlockSpec(shape, idx)


def _vmem_config(dim):
    """Generation-aware x-tile byte budget + explicit scoped-VMEM limit."""
    try:
        vmem_cap = int(pltpu.get_tpu_info().vmem_capacity_bytes)
    except Exception:
        vmem_cap = 64 << 20                      # conservative (v7x-sized) default
    # v5e/v6e (128 MiB physical): 8 MiB x tiles.  v7x (64 MiB / TC): 4 MiB.
    x_tile_budget = (8 << 20) if vmem_cap >= (100 << 20) else (4 << 20)
    vmem_limit = max(32 << 20, min((vmem_cap * 3) // 4, 100 << 20))
    # Leave room for the single-buffered resident W1 plus slack.
    w1_bytes = dim * HIDDEN_PAD * 4
    x_tile_budget = min(x_tile_budget,
                        max((vmem_limit - w1_bytes - (2 << 20)) // 2, 256 << 10))
    return int(x_tile_budget), int(vmem_limit)


@functools.partial(jax.jit, static_argnames=("x_tile_budget_bytes",))
def reward_model_forward(x, params, x_tile_budget_bytes=None):
    """Pallas forward of RewardModel (inference branch).
    x: (batch, dim) float32 -> (batch, 1) float32."""
    B, dim = x.shape

    # ---- fold (out - f_mean)/f_std into the last layer ---------------------
    inv_std = 1.0 / params["f_std"].astype(jnp.float32)
    w3_fold = params["W3"].astype(jnp.float32) * inv_std              # (HIDDEN, 1)
    b3_fold = (params["b3"].astype(jnp.float32) - params["f_mean"]) * inv_std

    w1 = _pad_to(params["W1"].astype(jnp.float32), (dim, HIDDEN_PAD))  # (dim,128)
    b1 = _pad_to(params["b1"].astype(jnp.float32)[None, :], (1, HIDDEN_PAD))
    w2 = _pad_to(params["W2"].astype(jnp.float32), (HIDDEN_PAD, HIDDEN_PAD))
    b2 = _pad_to(params["b2"].astype(jnp.float32)[None, :], (1, HIDDEN_PAD))
    w3 = _pad_to(w3_fold.T, (1, HIDDEN_PAD))                           # (1,128) row
    b3 = b3_fold.reshape(1, 1)                                         # (1,1)

    # ---- batch tiling: size x tile by bytes, no host-side padding of x -----
    auto_budget, vmem_limit = _vmem_config(dim)
    budget = x_tile_budget_bytes if x_tile_budget_bytes is not None else auto_budget
    budget_rows = (budget // (4 * max(dim, 1))) // 128 * 128
    budget_rows = int(min(max(budget_rows, 128), MAX_TB))

    if B <= budget_rows:
        TB = B            # single block; block dims == array dims (always legal)
    else:
        TB = budget_rows  # multiple of 128 -> lane-dense, edge block masked
    grid = (pl.cdiv(B, TB),)

    in_specs = [
        pl.BlockSpec((TB, dim), lambda i: (i, 0)),       # x: streamed per tile
        _resident_spec((dim, HIDDEN_PAD)),               # W1
        _resident_spec((1, HIDDEN_PAD)),                 # b1
        _resident_spec((HIDDEN_PAD, HIDDEN_PAD)),        # W2
        _resident_spec((1, HIDDEN_PAD)),                 # b2
        _resident_spec((1, HIDDEN_PAD)),                 # w3 row (folded)
        _resident_spec((1, 1)),                          # b3 (folded)
    ]
    # Lane-dense output: one (1, TB) row per grid step (lanes = batch rows).
    out_spec = pl.BlockSpec((1, TB), lambda i: (0, i))

    weight_bytes = 4 * (dim * HIDDEN_PAD + HIDDEN_PAD + HIDDEN_PAD * HIDDEN_PAD
                        + HIDDEN_PAD + HIDDEN_PAD + 1)
    cost = pl.CostEstimate(
        flops=2 * B * (dim * HIDDEN + HIDDEN * HIDDEN + HIDDEN),
        transcendentals=0,
        bytes_accessed=B * dim * 4 + weight_bytes + B * 4,
    )

    out_row = pl.pallas_call(
        reward_mlp_kernel,
        out_shape=jax.ShapeDtypeStruct((1, B), jnp.float32),
        grid=grid,
        in_specs=in_specs,
        out_specs=out_spec,
        compiler_params=pltpu.CompilerParams(
            dimension_semantics=("parallel",),
            vmem_limit_bytes=vmem_limit,
        ),
        cost_estimate=cost,
    )(x, w1, b1, w2, b2, w3, b3)

    return out_row.reshape(B, 1)


def init_params(dim, key):
    """Deterministic init mimicking nn.Linear's U(-1/sqrt(fan_in), +...)."""
    ks = jax.random.split(key, 6)

    def linear(kw, kb, fan_in, fan_out):
        bound = 1.0 / jnp.sqrt(jnp.float32(fan_in))
        W = jax.random.uniform(kw, (fan_in, fan_out), jnp.float32, -bound, bound)
        b = jax.random.uniform(kb, (fan_out,), jnp.float32, -bound, bound)
        return W, b

    W1, b1 = linear(ks[0], ks[1], dim, HIDDEN)
    W2, b2 = linear(ks[2], ks[3], HIDDEN, HIDDEN)
    W3, b3 = linear(ks[4], ks[5], HIDDEN, 1)
    return dict(W1=W1, b1=b1, W2=W2, b2=b2, W3=W3, b3=b3,
                f_mean=jnp.array(0.0, jnp.float32),
                f_std=jnp.array(1.0, jnp.float32))


def ref_forward(x, p):
    h1 = jnp.maximum(x @ p["W1"] + p["b1"], 0.0)
    h2 = jnp.maximum(h1 @ p["W2"] + p["b2"], 0.0)
    out = h2 @ p["W3"] + p["b3"]
    return (out - p["f_mean"]) / p["f_std"]


if __name__ == "__main__":
    batch, dim = 8, 32
    key = jax.random.PRNGKey(0)
    k_param, k_x = jax.random.split(key)
    params = init_params(dim, k_param)
    # non-trivial normalization buffers to exercise the folded path
    params["f_mean"] = jnp.array(0.25, jnp.float32)
    params["f_std"] = jnp.array(2.0, jnp.float32)
    x = jax.random.normal(k_x, (batch, dim), jnp.float32)

    out = jax.block_until_ready(reward_model_forward(x, params))
    expected = ref_forward(x, params)
    assert out.shape == (batch, 1), out.shape
    assert jnp.allclose(out, expected, atol=1e-5, rtol=1e-5), (out, expected)

    # batch not a multiple of 8 (single-tile path, unaligned size)
    x2 = jax.random.normal(jax.random.PRNGKey(1), (13, dim), jnp.float32)
    out2 = jax.block_until_ready(reward_model_forward(x2, params))
    assert out2.shape == (13, 1)
    assert jnp.allclose(out2, ref_forward(x2, params), atol=1e-5, rtol=1e-5)

    # multi-tile path with a masked partial edge block (forced 128-row tiles)
    x3 = jax.random.normal(jax.random.PRNGKey(2), (300, dim), jnp.float32)
    out3 = jax.block_until_ready(
        reward_model_forward(x3, params, x_tile_budget_bytes=128 * dim * 4))
    assert out3.shape == (300, 1)
    assert jnp.allclose(out3, ref_forward(x3, params), atol=1e-5, rtol=1e-5)

    print("KERNEL_OK")
</pallas_src>

<mosaic_0001>
module attributes {stable_mosaic.version = 11 : i64} {
  func.func @reward_mlp_kernel(%arg0: i32, %arg1: memref<8x32xf32, #tpu.memory_space<vmem>>, %arg2: memref<32x128xf32, #tpu.memory_space<vmem>>, %arg3: memref<1x128xf32, #tpu.memory_space<vmem>>, %arg4: memref<128x128xf32, #tpu.memory_space<vmem>>, %arg5: memref<1x128xf32, #tpu.memory_space<vmem>>, %arg6: memref<1x128xf32, #tpu.memory_space<vmem>>, %arg7: memref<1x1xf32, #tpu.memory_space<vmem>>, %arg8: memref<1x8xf32, #tpu.memory_space<vmem>>) attributes {dimension_semantics = [#tpu.dimension_semantics<parallel>], iteration_bounds = array<i64: 1>, scalar_prefetch = 0 : i64, scratch_operands = 0 : i64, tpu.core_type = #tpu.core_type<tc>, window_params = [{transform_indices = @transform_0, window_bounds = array<i64: 8, 32>}, {pipeline_mode = #tpu.pipeline_mode<synchronous>, transform_indices = @transform_1, window_bounds = array<i64: 32, 128>}, {pipeline_mode = #tpu.pipeline_mode<synchronous>, transform_indices = @transform_2, window_bounds = array<i64: 1, 128>}, {pipeline_mode = #tpu.pipeline_mode<synchronous>, transform_indices = @transform_3, window_bounds = array<i64: 128, 128>}, {pipeline_mode = #tpu.pipeline_mode<synchronous>, transform_indices = @transform_4, window_bounds = array<i64: 1, 128>}, {pipeline_mode = #tpu.pipeline_mode<synchronous>, transform_indices = @transform_5, window_bounds = array<i64: 1, 128>}, {pipeline_mode = #tpu.pipeline_mode<synchronous>, transform_indices = @transform_6, window_bounds = array<i64: 1, 1>}, {transform_indices = @transform_7, window_bounds = array<i64: 1, 8>}]} {
    %c0 = arith.constant 0 : index
    %c0_0 = arith.constant 0 : index
    %0 = vector.load %arg1[%c0, %c0_0] : memref<8x32xf32, #tpu.memory_space<vmem>>, vector<8x32xf32>
    %c0_1 = arith.constant 0 : index
    %c0_2 = arith.constant 0 : index
    %1 = vector.load %arg2[%c0_1, %c0_2] : memref<32x128xf32, #tpu.memory_space<vmem>>, vector<32x128xf32>
    %cst = arith.constant dense<0.000000e+00> : vector<8x128xf32>
    %2 = tpu.matmul %0, %1, %cst {dimension_numbers = #tpu.dot_dimension_numbers<[1], [0], [0], [1], [0, 0, 1, 1], [], []>} : vector<8x32xf32>, vector<32x128xf32>, vector<8x128xf32> -> vector<8x128xf32>
    %c0_3 = arith.constant 0 : index
    %c0_4 = arith.constant 0 : index
    %3 = vector.load %arg3[%c0_3, %c0_4] : memref<1x128xf32, #tpu.memory_space<vmem>>, vector<1x128xf32>
    %4 = vector.broadcast %3 : vector<1x128xf32> to vector<8x128xf32>
    %5 = arith.addf %2, %4 : vector<8x128xf32>
    %cst_5 = arith.constant 0.000000e+00 : f32
    %6 = vector.broadcast %cst_5 : f32 to vector<8x128xf32>
    %7 = arith.maximumf %5, %6 : vector<8x128xf32>
    %c0_6 = arith.constant 0 : index
    %c0_7 = arith.constant 0 : index
    %8 = vector.load %arg4[%c0_6, %c0_7] : memref<128x128xf32, #tpu.memory_space<vmem>>, vector<128x128xf32>
    %cst_8 = arith.constant dense<0.000000e+00> : vector<8x128xf32>
    %9 = tpu.matmul %7, %8, %cst_8 {dimension_numbers = #tpu.dot_dimension_numbers<[1], [0], [0], [1], [0, 0, 1, 1], [], []>} : vector<8x128xf32>, vector<128x128xf32>, vector<8x128xf32> -> vector<8x128xf32>
    %c0_9 = arith.constant 0 : index
    %c0_10 = arith.constant 0 : index
    %10 = vector.load %arg5[%c0_9, %c0_10] : memref<1x128xf32, #tpu.memory_space<vmem>>, vector<1x128xf32>
    %11 = vector.broadcast %10 : vector<1x128xf32> to vector<8x128xf32>
    %12 = arith.addf %9, %11 : vector<8x128xf32>
    %cst_11 = arith.constant 0.000000e+00 : f32
    %13 = vector.broadcast %cst_11 : f32 to vector<8x128xf32>
    %14 = arith.maximumf %12, %13 : vector<8x128xf32>
    %c0_12 = arith.constant 0 : index
    %c0_13 = arith.constant 0 : index
    %15 = vector.load %arg6[%c0_12, %c0_13] : memref<1x128xf32, #tpu.memory_space<vmem>>, vector<1x128xf32>
    %cst_14 = arith.constant dense<0.000000e+00> : vector<1x8xf32>
    %16 = tpu.matmul %15, %14, %cst_14 {dimension_numbers = #tpu.dot_dimension_numbers<[1], [1], [0], [0], [0, 0, 1, 0], [], []>} : vector<1x128xf32>, vector<8x128xf32>, vector<1x8xf32> -> vector<1x8xf32>
    %c0_15 = arith.constant 0 : index
    %c0_16 = arith.constant 0 : index
    %17 = vector.load %arg7[%c0_15, %c0_16] : memref<1x1xf32, #tpu.memory_space<vmem>>, vector<1x1xf32>
    %18 = vector.broadcast %17 : vector<1x1xf32> to vector<1x8xf32>
    %19 = arith.addf %16, %18 : vector<1x8xf32>
    %c0_17 = arith.constant 0 : index
    %c0_18 = arith.constant 0 : index
    %20 = vector.load %arg8[%c0_17, %c0_18] : memref<1x8xf32, #tpu.memory_space<vmem>>, vector<1x8xf32>
    tpu.vector_store %arg8[%c0_17, %c0_18], %19 {strides = array<i32>} : memref<1x8xf32, #tpu.memory_space<vmem>>, vector<1x8xf32>,
    return
  }
  func.func @transform_0(%arg0: i32) -> (i32, i32) {
    %c0_i32 = arith.constant 0 : i32
    %c0_i32_0 = arith.constant 0 : i32
    return %arg0, %c0_i32 : i32, i32
  }
  func.func @transform_1(%arg0: i32) -> (i32, i32) {
    %c0_i32 = arith.constant 0 : i32
    %c0_i32_0 = arith.constant 0 : i32
    %c0_i32_1 = arith.constant 0 : i32
    return %c0_i32, %c0_i32_0 : i32, i32
  }
  func.func @transform_2(%arg0: i32) -> (i32, i32) {
    %c0_i32 = arith.constant 0 : i32
    %c0_i32_0 = arith.constant 0 : i32
    %c0_i32_1 = arith.constant 0 : i32
    return %c0_i32, %c0_i32_0 : i32, i32
  }
  func.func @transform_3(%arg0: i32) -> (i32, i32) {
    %c0_i32 = arith.constant 0 : i32
    %c0_i32_0 = arith.constant 0 : i32
    %c0_i32_1 = arith.constant 0 : i32
    return %c0_i32, %c0_i32_0 : i32, i32
  }
  func.func @transform_4(%arg0: i32) -> (i32, i32) {
    %c0_i32 = arith.constant 0 : i32
    %c0_i32_0 = arith.constant 0 : i32
    %c0_i32_1 = arith.constant 0 : i32
    return %c0_i32, %c0_i32_0 : i32, i32
  }
  func.func @transform_5(%arg0: i32) -> (i32, i32) {
    %c0_i32 = arith.constant 0 : i32
    %c0_i32_0 = arith.constant 0 : i32
    %c0_i32_1 = arith.constant 0 : i32
    return %c0_i32, %c0_i32_0 : i32, i32
  }
  func.func @transform_6(%arg0: i32) -> (i32, i32) {
    %c0_i32 = arith.constant 0 : i32
    %c0_i32_0 = arith.constant 0 : i32
    %c0_i32_1 = arith.constant 0 : i32
    return %c0_i32, %c0_i32_0 : i32, i32
  }
  func.func @transform_7(%arg0: i32) -> (i32, i32) {
    %c0_i32 = arith.constant 0 : i32
    %c0_i32_0 = arith.constant 0 : i32
    return %c0_i32, %arg0 : i32, i32
  }
}

</mosaic_0001>

<bundles_post_ra>
// kernel: reward_model_forward.1
= control target key start
LH: loop header
LB: loop body
LE: loop exit
PB: predicated region body
PF: predicated region fallthrough
CT: control target
= control target key end

     0   :  { %s561_s0 = inlined_call_operand.vmem [shape: f32[8,32], index: 0, kind: input, shape index: {}]   ;;  %s562_s1 = inlined_call_operand.vmem [shape: f32[32,128], index: 1, kind: input, shape index: {}]   ;;  %s563_s2 = inlined_call_operand.vmem [shape: f32[1,128], index: 2, kind: input, shape index: {}]   ;;  %s564_s3 = inlined_call_operand.vmem [shape: f32[128,128], index: 3, kind: input, shape index: {}]   ;;  %s565_s4 = inlined_call_operand.vmem [shape: f32[1,128], index: 4, kind: input, shape index: {}]   ;;  %s566_s5 = inlined_call_operand.vmem [shape: f32[1,128], index: 5, kind: input, shape index: {}]   ;;  %s567_s6 = inlined_call_operand.<no memory space> [shape: f32[1,1], index: 6, kind: input, shape index: {}]   ;;  %s568_s7 = inlined_call_operand.hbm [shape: f32[1,8], index: 7, kind: output, shape index: {}]  }
   0x1   :  { %v12_v0 = vstv %s567_s6 }
   0x2   :  { %13 = vst [vmem:[#allocation2] sm:$0x1] %v12_v0 }
   0x3   :  { %v33_v1 = vld [vmem:[%s562_s1 + $0x18] sm:$0xff]  ;;  %v412_v2 = vmov 0.0   ;;  %v32_v3 = vld [vmem:[%s562_s1 + $0x10] sm:$0xff]  ;;  %vm413_vm0 = vmmov 0   ;;  %v31_v6 = vld [vmem:[%s562_s1 + $0x8] sm:$0xff]  ;;  %vm41_vm1 = vcmask 261120  }
   0x4   :  { %334 = vmatprep.subr.mxu0 %v412_v2  ;;  %342 = vmatprep.mubr.msk.f32.mxu0 %vm413_vm0, %v412_v2  ;;  %v131_v4 = vld [vmem:[%s564_s3 + $0x78] sm:$0xff]  ;;  %v130_v5 = vld [vmem:[%s564_s3 + $0x70] sm:$0xff]  ;;  %v129_v7 = vld [vmem:[%s564_s3 + $0x68] sm:$0xff] }
   0x5   :  { %335 = vmatpush3.msra.mxu0 %v33_v1  ;;  %345 = vmatprep.subr.mxu1 %v412_v2  ;;  %v30_v8 = vld [vmem:[%s562_s1] sm:$0xff] }
   0x6   :  { %336 = vmatprep.subr.mxu0 %v412_v2  ;;  %346 = vmatpush3.msra.mxu1 %v131_v4  ;;  %v29_v9 = vld [vmem:[%s561_s0] sm:$0xff] }
   0x7   :  { %337 = vmatpush3.msra.mxu0 %v32_v3  ;;  %347 = vmatprep.subr.mxu1 %v412_v2  ;;  %v128_v10 = vld [vmem:[%s564_s3 + $0x60] sm:$0xff] }
   0x8   :  { %338 = vmatprep.subr.mxu0 %v412_v2  ;;  %348 = vmatpush3.msra.mxu1 %v130_v5 }
   0x9   :  { %339 = vmatpush3.msra.mxu0 %v31_v6  ;;  %349 = vmatprep.subr.mxu1 %v412_v2 }
   0xa   :  { %14 = vsyncpa [#allocation4], 0  ;;  %340 = vmatprep.subr.mxu0 %v412_v2  ;;  %350 = vmatpush3.msra.mxu1 %v129_v7  ;;  %v127_v11 = vld [vmem:[%s564_s3 + $0x58] sm:$0xff]  ;;  %v126_v12 = vld [vmem:[%s564_s3 + $0x50] sm:$0xff]  ;;  %v414_v29 = vmov 0   ;;  %v217_v36 = vlaneseq  ;;  %s415_s0 = smov [#allocation3]  }
   0xb   :  { %341 = vmatpush3.msra.mxu0 %v30_v8  ;;  %351 = vmatprep.subr.mxu1 %v412_v2  ;;  %v125_v13 = vld [vmem:[%s564_s3 + $0x48] sm:$0xff]  ;;  %v124_v14 = vld [vmem:[%s564_s3 + $0x40] sm:$0xff]  ;;  %v123_v15 = vld [vmem:[%s564_s3 + $0x38] sm:$0xff]  ;;  %s299_s21 = sshll.u32 %s415_s0, 4  ;;  %vm291_vm2 = vcmask 57344   ;;  %s300_s21 = int_to_ptr.vmem [resolvable:$true] %s299_s21 }
   0xc   :  { %343 = vmatmul.mubr.msk.f32.vlgmr.msra.gmra.mxu0 %vm41_vm1, %v29_v9  ;;  %352 = vmatpush3.msra.mxu1 %v128_v10  ;;  %v122_v16 = vld [vmem:[%s564_s3 + $0x30] sm:$0xff]  ;;  %v121_v17 = vld [vmem:[%s564_s3 + $0x28] sm:$0xff]  ;;  %v120_v18 = vld [vmem:[%s564_s3 + $0x20] sm:$0xff]  ;;  %v218_v37 = vshrl.u32 %v217_v36, 7  ;;  %s394_s22 = scalar_lea.vmem %s300_s21, 32  ;;  %p395_p1 = scmp.lt.s32.totalorder %s300_s21, %s300_s21 }
   0xd   :  { %353 = vmatprep.subr.mxu1 %v412_v2  ;;  %377 = vmatprep.mubr.msk.f32.mxu1 %vm413_vm0, %v412_v2  ;;  %v119_v19 = vld [vmem:[%s564_s3 + $0x18] sm:$0xff]  ;;  %v118_v20 = vld [vmem:[%s564_s3 + $0x10] sm:$0xff]  ;;  %v117_v21 = vld [vmem:[%s564_s3 + $0x8] sm:$0xff] }
   0xe   :  { %354 = vmatpush3.msra.mxu1 %v127_v11  ;;  %380 = vmatprep.subr.mxu0 %v412_v2  ;;  %v116_v22 = vld [vmem:[%s564_s3] sm:$0xff]  ;;  %v219_v38 = vsub.s32 0, %v218_v37 }
   0xf   :  { %355 = vmatprep.subr.mxu1 %v412_v2  ;;  %382 = vmatprep.mubr.msk.f32.mxu0 %vm413_vm0, %v412_v2  ;;  %v307_v23 = vld [vmem:[%s563_s2] ss:$0 sm:$0xff] }
  0x10   :  { %356 = vmatpush3.msra.mxu1 %v126_v12  ;;  %v211_v28 = vld [vmem:[#allocation2] sm:$0x1]  ;;  %389 = vset.pattern.permute.xlu0 %v414_v29 }
  0x11   :  { %357 = vmatprep.subr.mxu1 %v412_v2  ;;  %214 = vperm.xlu0 %389, %v211_v28   ;;  %v309_v30 = vld [vmem:[%s565_s4] ss:$0 sm:$0xff]  ;;  %s390_s4 = scalar_lea.vmem %s300_s21, 16 }
  0x12   :  { %358 = vmatpush3.msra.mxu1 %v125_v13  ;;  %v210_v35 = vld [vmem:[%s566_s5] sm:$0x1]  ;;  %p391_p0 = scmp.ne.s32.totalorder %s300_s21, %s390_s4  ;;  %p396_p2 = scmp.lt.s32.totalorder %s394_s22, %s390_s4 }
  0x13   :  { %359 = vmatprep.subr.mxu1 %v412_v2 }
  0x14   :  { %360 = vmatpush3.msra.mxu1 %v124_v14  ;;  %p397_p3 = por %p396_p2, %p395_p1 }
  0x15   :  { %361 = vmatprep.subr.mxu1 %v412_v2 }
  0x16   :  { %362 = vmatpush3.msra.mxu1 %v123_v15  ;;  %p398_p4 = pnand %p397_p3, %p391_p0 }
  0x17   :  { %363 = vmatprep.subr.mxu1 %v412_v2 }
  0x18   :  { %364 = vmatpush3.msra.mxu1 %v122_v16 }
  0x19   :  { %365 = vmatprep.subr.mxu1 %v412_v2 }
  0x1a   :  { %366 = vmatpush3.msra.mxu1 %v121_v17 }
  0x1b   :  { %367 = vmatprep.subr.mxu1 %v412_v2 }
  0x1c   :  { %368 = vmatpush3.msra.mxu1 %v120_v18 }
  0x1d   :  { %369 = vmatprep.subr.mxu1 %v412_v2 }
  0x1e   :  { %370 = vmatpush3.msra.mxu1 %v119_v19 }
  0x1f   :  { %371 = vmatprep.subr.mxu1 %v412_v2 }
  0x20   :  { %372 = vmatpush3.msra.mxu1 %v118_v20 }
  0x21   :  { %373 = vmatprep.subr.mxu1 %v412_v2 }
  0x22   :  { %374 = vmatpush3.msra.mxu1 %v117_v21 }
  0x23   :  { %375 = vmatprep.subr.mxu1 %v412_v2 }
  0x24   :  { %376 = vmatpush3.msra.mxu1 %v116_v22 }
  0x8c   :  { %v215_v39 = vpop.permute.xlu0 %214 }
  0x8d   :  { %v220_v40 = vrot.slane %v215_v39, %v219_v38 }
  0xcc   :  { %v111_v24 = vpop.f32.mrf.mxu0 }
  0xcd   :  { %v112_v25 = vadd.f32 %v307_v23, %v111_v24 }
  0xce   :  { %v344_v26 = vpop.f32.mrf.mxu0 }
  0xcf   :  { %v115_v27 = vmax.f32 %v112_v25, 0.0 }
  0xd1   :  { %378 = vmatmul.mubr.f32.vlgmr.msra.gmra.mxu1 %v115_v27 }
 0x191   :  { %v205_v31 = vpop.f32.mrf.mxu1 }
 0x192   :  { %v206_v32 = vadd.f32 %v309_v30, %v205_v31 }
 0x193   :  { %v379_v33 = vpop.f32.mrf.mxu1 }
 0x194   :  { %v209_v34 = vmax.f32 %v206_v32, 0.0 }
 0x196   :  { %381 = vmatpush3.xpose.msra.mxu0 %v209_v34 }
 0x199   :  { %383 = vmatmul.mubr.f32.vlgmr.msra.gmra.mxu0 %v210_v35 }
 0x259   :  { %v287_v41 = vpop.f32.mrf.mxu0 }
 0x25a   :  { %v288_v42 = vadd.f32 %v287_v41, %v220_v40 }
 0x25b   :  { %v384_v43 = vpop.f32.mrf.mxu0 }
 0x25c   :  { %292 = vst.msk [vmem:[#allocation3] sm:$0x1] %vm291_vm2, %v288_v42 }
 0x25d   :  { %401 = shalt.err (!%p398_p4)
}
 0x25e   :  { %302 = dma.vmem_to_hbm [thread:$0]  %s300_s21, 16, %s568_s7, [#allocation4]  }
 0x25f   :  { %410 = dma.done.wait [#allocation4], 16  }
 0x260   :  { %411 = vsyncadd [#allocation4], 4294967280 }
 0x261   :  { %306 = vsyncpa [#allocation4], 1 }

</bundles_post_ra>
